<compile_context>
chip_gen: v7x
topology: tpu7x:2x2x1
jax: 0.10.0
libtpu: 0.0.40
codegen_flags: <defaults>
</compile_context>

<pallas_src>
import functools

import jax
import jax.numpy as jnp
from jax.experimental import pallas as pl
from jax.experimental.pallas import tpu as pltpu


# ------------------------------ fused kernel --------------------------------

def _fused_mha_kernel(x_ref, wqkv_ref, bqkv_ref, mask_ref, wout_ref, bout_ref,
                      o_ref, *, num_heads, scaling):
    """Fused QKV projection + masked softmax attention + output projection.

    x_ref:    (N, E)        N = tgt_len * bsz, rows ordered r = t*bsz + b
    wqkv_ref: (3, H, E, D)  head-major restacked QKV weights ([q|k|v] major)
    bqkv_ref: (3, H, 1, D)
    mask_ref: (N, N)        combined additive mask (attn_mask quirk +
                            key_padding_mask.T + cross-batch -inf blocks)
    wout_ref: (H, D, E)     output-projection weights split per head
    bout_ref: (1, E)
    o_ref:    (N, E)        rows ordered r = t*bsz + b == b2*tgt_len + t2
    """
    x = x_ref[...]                       # (N, E) f32, stays in VMEM throughout
    mask_add = mask_ref[...]             # (N, N) f32, loaded once (hoisted)
    neg_inf = jnp.float32(-jnp.inf)

    acc = jnp.zeros(o_ref.shape, jnp.float32)
    for h in range(num_heads):           # H is tiny -> fully unrolled, no grid
        wq = wqkv_ref[0, h]              # (E, D) leading-dim ref index only
        wk = wqkv_ref[1, h]
        wv = wqkv_ref[2, h]
        q = jnp.dot(x, wq, preferred_element_type=jnp.float32) + bqkv_ref[0, h]
        k = jnp.dot(x, wk, preferred_element_type=jnp.float32) + bqkv_ref[1, h]
        v = jnp.dot(x, wv, preferred_element_type=jnp.float32) + bqkv_ref[2, h]

        # scores = (q @ k^T) * scaling ; contract last dims, no explicit .T
        s = jax.lax.dot_general(q, k, (((1,), (1,)), ((), ())),
                                preferred_element_type=jnp.float32)
        s = s * jnp.float32(scaling)

        # reference quirk: exact zeros -> -inf, then the precomputed additive
        # mask (attn_mask*-1e4, key_padding_mask.T -> -inf, cross-batch -inf).
        s = jnp.where(s == 0.0, neg_inf, s) + mask_add

        # softmax over the key axis (dropout p=0.0 is the identity)
        m = jnp.max(s, axis=-1, keepdims=True)
        e = jnp.exp(s - m)
        denom = jnp.sum(e, axis=-1, keepdims=True)
        p = e * pl.reciprocal(denom, approx=True)

        ctx = jnp.dot(p, v, preferred_element_type=jnp.float32)      # (N, D)
        # output projection, accumulated per head:
        #   out += ctx_h @ W_out[h*D:(h+1)*D, :]
        acc = acc + jnp.dot(ctx, wout_ref[h],
                            preferred_element_type=jnp.float32)

    o_ref[...] = (acc + bout_ref[...]).astype(o_ref.dtype)


# ----------------------------- module wrapper --------------------------------

def init_params(key, embed_dim):
    k1, k2, k3, k4 = jax.random.split(key, 4)
    E = embed_dim
    # Stored already transposed relative to torch.nn.Linear: (in, out).
    return {
        "w_qkv": jax.random.normal(k1, (E, 3 * E), jnp.float32) * 0.05,
        "b_qkv": jax.random.normal(k2, (1, 3 * E), jnp.float32) * 0.05,
        "w_out": jax.random.normal(k3, (E, E), jnp.float32) * 0.05,
        "b_out": jax.random.normal(k4, (1, E), jnp.float32) * 0.05,
    }


def multihead_attention_forward(params, num_heads, query, key, value,
                                attn_mask, key_padding_mask):
    # key / value are only consulted for their shapes in the reference module.
    del key, value
    tgt_len, bsz, embed_dim = query.shape
    H = num_heads
    D = embed_dim // H
    N = tgt_len * bsz
    scaling = D ** (-0.5)
    neg_inf = jnp.float32(-jnp.inf)

    # ---- one-time parameter re-layout (head-major), outside the kernel ----
    # QKV columns are ordered (head, [q|k|v], d): column = h*3D + j*D + d.
    w_qkv = params["w_qkv"].reshape(embed_dim, H, 3, D).transpose(2, 1, 0, 3)
    b_qkv = params["b_qkv"].reshape(1, H, 3, D).transpose(2, 1, 0, 3)
    # Output-projection rows split per head: (H, D, E).
    w_out = params["w_out"].reshape(H, D, embed_dim)
    b_out = params["b_out"]

    # ---- combined additive mask, computed once (hoisted out of the kernel) ---
    # reference: s==0 -> -inf ; + where(am==0, 0, am*-1e4) ;
    #            where(kpm.T==0, s, -inf) ; softmax
    am = jnp.where(attn_mask == 0.0, jnp.float32(0.0),
                   attn_mask * jnp.float32(-10000.0))              # (T, T)
    add_tt = jnp.where(key_padding_mask.T == 0.0, am, neg_inf)     # (T, T)
    # Expand to (N, N): rows r = t*B + b1, cols c = u*B + b2; cross-batch -inf.
    same_b = jnp.where(jnp.eye(bsz, dtype=jnp.float32) > 0.0,
                       jnp.float32(0.0), neg_inf)                  # (B, B)
    mask_add = (add_tt[:, None, :, None] +
                same_b[None, :, None, :]).reshape(N, N)            # (N, N)

    x2d = query.reshape(N, embed_dim)    # rows ordered r = t*bsz + b

    kernel = functools.partial(_fused_mha_kernel,
                               num_heads=H, scaling=scaling)
    out2d = pl.pallas_call(
        kernel,
        out_shape=jax.ShapeDtypeStruct((N, embed_dim), jnp.float32),
        grid=(1,),
        in_specs=[
            pl.BlockSpec((N, embed_dim), lambda i: (0, 0)),
            pl.BlockSpec((3, H, embed_dim, D), lambda i: (0, 0, 0, 0)),
            pl.BlockSpec((3, H, 1, D), lambda i: (0, 0, 0, 0)),
            pl.BlockSpec((N, N), lambda i: (0, 0)),
            pl.BlockSpec((H, D, embed_dim), lambda i: (0, 0, 0)),
            pl.BlockSpec((1, embed_dim), lambda i: (0, 0)),
        ],
        out_specs=pl.BlockSpec((N, embed_dim), lambda i: (0, 0)),
        compiler_params=pltpu.CompilerParams(
            dimension_semantics=("arbitrary",)),
    )(x2d, w_qkv, b_qkv, mask_add, w_out, b_out)

    # The reference's attn_output.transpose(0,1).reshape(bsz, T, E) followed by
    # the row-wise out_proj yields rows in exactly flat order r = t*bsz + b
    # == b2*tgt_len + t2, so the final (bsz, T, E) view is a plain reshape.
    return out2d.reshape(bsz, tgt_len, embed_dim)


# ---------------------------------- main --------------------------------------

if __name__ == "__main__":
    embed_dim = 32
    num_heads = 4
    tgt_len = 8
    src_len = 8
    bsz = 2

    root = jax.random.PRNGKey(0)
    kp, kq, kk, kv, km1, km2 = jax.random.split(root, 6)

    params = init_params(kp, embed_dim)

    query = jax.random.normal(kq, (tgt_len, bsz, embed_dim), jnp.float32)
    key = jax.random.normal(kk, (src_len, bsz, embed_dim), jnp.float32)
    value = jax.random.normal(kv, (src_len, bsz, embed_dim), jnp.float32)

    # Additive attn_mask: ~half zeros, rest small positive values.
    u1 = jax.random.uniform(km1, (tgt_len, tgt_len), jnp.float32)
    attn_mask = jnp.where(u1 < 0.5, 0.0, u1 * 1e-3).astype(jnp.float32)

    # key_padding_mask: nonzero entries get masked to -inf; keep most at 0.
    u2 = jax.random.uniform(km2, (tgt_len, tgt_len), jnp.float32)
    key_padding_mask = jnp.where(u2 > 0.8, 1.0, 0.0).astype(jnp.float32)

    fwd = jax.jit(multihead_attention_forward, static_argnums=(1,))
    out = fwd(params, num_heads, query, key, value, attn_mask, key_padding_mask)
    jax.block_until_ready(out)
    assert out.shape == (bsz, tgt_len, embed_dim)
    print("KERNEL_OK")
</pallas_src>

<mosaic_0001>
module attributes {stable_mosaic.version = 11 : i64} {
  func.func @_fused_mha_kernel(%arg0: i32, %arg1: memref<16x32xf32, #tpu.memory_space<vmem>>, %arg2: memref<3x4x32x8xf32, #tpu.memory_space<vmem>>, %arg3: memref<3x4x1x8xf32, #tpu.memory_space<vmem>>, %arg4: memref<16x16xf32, #tpu.memory_space<vmem>>, %arg5: memref<4x8x32xf32, #tpu.memory_space<vmem>>, %arg6: memref<1x32xf32, #tpu.memory_space<vmem>>, %arg7: memref<16x32xf32, #tpu.memory_space<vmem>>) attributes {dimension_semantics = [#tpu.dimension_semantics<arbitrary>], iteration_bounds = array<i64: 1>, scalar_prefetch = 0 : i64, scratch_operands = 0 : i64, tpu.core_type = #tpu.core_type<tc>, window_params = [{pipeline_mode = #tpu.pipeline_mode<synchronous>, transform_indices = @transform_0, window_bounds = array<i64: 16, 32>}, {pipeline_mode = #tpu.pipeline_mode<synchronous>, transform_indices = @transform_1, window_bounds = array<i64: 3, 4, 32, 8>}, {pipeline_mode = #tpu.pipeline_mode<synchronous>, transform_indices = @transform_2, window_bounds = array<i64: 3, 4, 1, 8>}, {pipeline_mode = #tpu.pipeline_mode<synchronous>, transform_indices = @transform_3, window_bounds = array<i64: 16, 16>}, {pipeline_mode = #tpu.pipeline_mode<synchronous>, transform_indices = @transform_4, window_bounds = array<i64: 4, 8, 32>}, {pipeline_mode = #tpu.pipeline_mode<synchronous>, transform_indices = @transform_5, window_bounds = array<i64: 1, 32>}, {pipeline_mode = #tpu.pipeline_mode<synchronous>, transform_indices = @transform_6, window_bounds = array<i64: 16, 32>}]} {
    %c0 = arith.constant 0 : index
    %c0_0 = arith.constant 0 : index
    %0 = vector.load %arg1[%c0, %c0_0] : memref<16x32xf32, #tpu.memory_space<vmem>>, vector<16x32xf32>
    %c0_1 = arith.constant 0 : index
    %c0_2 = arith.constant 0 : index
    %1 = vector.load %arg4[%c0_1, %c0_2] : memref<16x16xf32, #tpu.memory_space<vmem>>, vector<16x16xf32>
    %cst = arith.constant 0.000000e+00 : f32
    %2 = vector.broadcast %cst : f32 to vector<16x32xf32>
    %c0_3 = arith.constant 0 : index
    %c0_4 = arith.constant 0 : index
    %c0_5 = arith.constant 0 : index
    %c0_6 = arith.constant 0 : index
    %3 = vector.load %arg2[%c0_3, %c0_4, %c0_5, %c0_6] : memref<3x4x32x8xf32, #tpu.memory_space<vmem>>, vector<1x1x32x8xf32>
    %4 = vector.shape_cast %3 : vector<1x1x32x8xf32> to vector<32x8xf32>
    %c1 = arith.constant 1 : index
    %c0_7 = arith.constant 0 : index
    %c0_8 = arith.constant 0 : index
    %c0_9 = arith.constant 0 : index
    %5 = vector.load %arg2[%c1, %c0_7, %c0_8, %c0_9] : memref<3x4x32x8xf32, #tpu.memory_space<vmem>>, vector<1x1x32x8xf32>
    %6 = vector.shape_cast %5 : vector<1x1x32x8xf32> to vector<32x8xf32>
    %c2 = arith.constant 2 : index
    %c0_10 = arith.constant 0 : index
    %c0_11 = arith.constant 0 : index
    %c0_12 = arith.constant 0 : index
    %7 = vector.load %arg2[%c2, %c0_10, %c0_11, %c0_12] : memref<3x4x32x8xf32, #tpu.memory_space<vmem>>, vector<1x1x32x8xf32>
    %8 = vector.shape_cast %7 : vector<1x1x32x8xf32> to vector<32x8xf32>
    %cst_13 = arith.constant dense<0.000000e+00> : vector<16x8xf32>
    %9 = tpu.matmul %0, %4, %cst_13 {dimension_numbers = #tpu.dot_dimension_numbers<[1], [0], [0], [1], [0, 0, 1, 1], [], []>} : vector<16x32xf32>, vector<32x8xf32>, vector<16x8xf32> -> vector<16x8xf32>
    %c0_14 = arith.constant 0 : index
    %c0_15 = arith.constant 0 : index
    %c0_16 = arith.constant 0 : index
    %c0_17 = arith.constant 0 : index
    %10 = vector.load %arg3[%c0_14, %c0_15, %c0_16, %c0_17] : memref<3x4x1x8xf32, #tpu.memory_space<vmem>>, vector<1x1x1x8xf32>
    %11 = vector.shape_cast %10 : vector<1x1x1x8xf32> to vector<1x8xf32>
    %12 = vector.broadcast %11 : vector<1x8xf32> to vector<16x8xf32>
    %13 = arith.addf %9, %12 : vector<16x8xf32>
    %cst_18 = arith.constant dense<0.000000e+00> : vector<16x8xf32>
    %14 = tpu.matmul %0, %6, %cst_18 {dimension_numbers = #tpu.dot_dimension_numbers<[1], [0], [0], [1], [0, 0, 1, 1], [], []>} : vector<16x32xf32>, vector<32x8xf32>, vector<16x8xf32> -> vector<16x8xf32>
    %c1_19 = arith.constant 1 : index
    %c0_20 = arith.constant 0 : index
    %c0_21 = arith.constant 0 : index
    %c0_22 = arith.constant 0 : index
    %15 = vector.load %arg3[%c1_19, %c0_20, %c0_21, %c0_22] : memref<3x4x1x8xf32, #tpu.memory_space<vmem>>, vector<1x1x1x8xf32>
    %16 = vector.shape_cast %15 : vector<1x1x1x8xf32> to vector<1x8xf32>
    %17 = vector.broadcast %16 : vector<1x8xf32> to vector<16x8xf32>
    %18 = arith.addf %14, %17 : vector<16x8xf32>
    %cst_23 = arith.constant dense<0.000000e+00> : vector<16x8xf32>
    %19 = tpu.matmul %0, %8, %cst_23 {dimension_numbers = #tpu.dot_dimension_numbers<[1], [0], [0], [1], [0, 0, 1, 1], [], []>} : vector<16x32xf32>, vector<32x8xf32>, vector<16x8xf32> -> vector<16x8xf32>
    %c2_24 = arith.constant 2 : index
    %c0_25 = arith.constant 0 : index
    %c0_26 = arith.constant 0 : index
    %c0_27 = arith.constant 0 : index
    %20 = vector.load %arg3[%c2_24, %c0_25, %c0_26, %c0_27] : memref<3x4x1x8xf32, #tpu.memory_space<vmem>>, vector<1x1x1x8xf32>
    %21 = vector.shape_cast %20 : vector<1x1x1x8xf32> to vector<1x8xf32>
    %22 = vector.broadcast %21 : vector<1x8xf32> to vector<16x8xf32>
    %23 = arith.addf %19, %22 : vector<16x8xf32>
    %cst_28 = arith.constant dense<0.000000e+00> : vector<16x16xf32>
    %24 = tpu.matmul %13, %18, %cst_28 {dimension_numbers = #tpu.dot_dimension_numbers<[1], [1], [0], [0], [0, 0, 1, 0], [], []>} : vector<16x8xf32>, vector<16x8xf32>, vector<16x16xf32> -> vector<16x16xf32>
    %cst_29 = arith.constant 0.353553385 : f32
    %25 = vector.broadcast %cst_29 : f32 to vector<16x16xf32>
    %26 = arith.mulf %24, %25 : vector<16x16xf32>
    %cst_30 = arith.constant 0.000000e+00 : f32
    %27 = vector.broadcast %cst_30 : f32 to vector<16x16xf32>
    %28 = arith.cmpf oeq, %26, %27 : vector<16x16xf32>
    %cst_31 = arith.constant 0xFF800000 : f32
    %29 = vector.broadcast %cst_31 : f32 to vector<16x16xf32>
    %30 = arith.select %28, %29, %26 : vector<16x16xi1>, vector<16x16xf32>
    %31 = arith.addf %30, %1 : vector<16x16xf32>
    %cst_32 = arith.constant dense<0xFF800000> : vector<16xf32>
    %32 = vector.multi_reduction <maximumf>, %31, %cst_32 [1] : vector<16x16xf32> to vector<16xf32>
    %33 = vector.shape_cast %32 : vector<16xf32> to vector<16x1xf32>
    %34 = vector.broadcast %33 : vector<16x1xf32> to vector<16x16xf32>
    %35 = arith.subf %31, %34 : vector<16x16xf32>
    %36 = math.exp %35 : vector<16x16xf32>
    %cst_33 = arith.constant dense<0.000000e+00> : vector<16xf32>
    %37 = vector.multi_reduction <add>, %36, %cst_33 [1] : vector<16x16xf32> to vector<16xf32>
    %38 = vector.shape_cast %37 : vector<16xf32> to vector<16x1xf32>
    %39 = tpu.reciprocal %38 {approx = true} : vector<16x1xf32> -> vector<16x1xf32>
    %40 = vector.broadcast %39 : vector<16x1xf32> to vector<16x16xf32>
    %41 = arith.mulf %36, %40 : vector<16x16xf32>
    %cst_34 = arith.constant dense<0.000000e+00> : vector<16x8xf32>
    %42 = tpu.matmul %41, %23, %cst_34 {dimension_numbers = #tpu.dot_dimension_numbers<[1], [0], [0], [1], [0, 0, 1, 1], [], []>} : vector<16x16xf32>, vector<16x8xf32>, vector<16x8xf32> -> vector<16x8xf32>
    %c0_35 = arith.constant 0 : index
    %c0_36 = arith.constant 0 : index
    %c0_37 = arith.constant 0 : index
    %43 = vector.load %arg5[%c0_35, %c0_36, %c0_37] : memref<4x8x32xf32, #tpu.memory_space<vmem>>, vector<1x8x32xf32>
    %44 = vector.shape_cast %43 : vector<1x8x32xf32> to vector<8x32xf32>
    %cst_38 = arith.constant dense<0.000000e+00> : vector<16x32xf32>
    %45 = tpu.matmul %42, %44, %cst_38 {dimension_numbers = #tpu.dot_dimension_numbers<[1], [0], [0], [1], [0, 0, 1, 1], [], []>} : vector<16x8xf32>, vector<8x32xf32>, vector<16x32xf32> -> vector<16x32xf32>
    %46 = arith.addf %2, %45 : vector<16x32xf32>
    %c0_39 = arith.constant 0 : index
    %c1_40 = arith.constant 1 : index
    %c0_41 = arith.constant 0 : index
    %c0_42 = arith.constant 0 : index
    %47 = vector.load %arg2[%c0_39, %c1_40, %c0_41, %c0_42] : memref<3x4x32x8xf32, #tpu.memory_space<vmem>>, vector<1x1x32x8xf32>
    %48 = vector.shape_cast %47 : vector<1x1x32x8xf32> to vector<32x8xf32>
    %c1_43 = arith.constant 1 : index
    %c1_44 = arith.constant 1 : index
    %c0_45 = arith.constant 0 : index
    %c0_46 = arith.constant 0 : index
    %49 = vector.load %arg2[%c1_43, %c1_44, %c0_45, %c0_46] : memref<3x4x32x8xf32, #tpu.memory_space<vmem>>, vector<1x1x32x8xf32>
    %50 = vector.shape_cast %49 : vector<1x1x32x8xf32> to vector<32x8xf32>
    %c2_47 = arith.constant 2 : index
    %c1_48 = arith.constant 1 : index
    %c0_49 = arith.constant 0 : index
    %c0_50 = arith.constant 0 : index
    %51 = vector.load %arg2[%c2_47, %c1_48, %c0_49, %c0_50] : memref<3x4x32x8xf32, #tpu.memory_space<vmem>>, vector<1x1x32x8xf32>
    %52 = vector.shape_cast %51 : vector<1x1x32x8xf32> to vector<32x8xf32>
    %cst_51 = arith.constant dense<0.000000e+00> : vector<16x8xf32>
    %53 = tpu.matmul %0, %48, %cst_51 {dimension_numbers = #tpu.dot_dimension_numbers<[1], [0], [0], [1], [0, 0, 1, 1], [], []>} : vector<16x32xf32>, vector<32x8xf32>, vector<16x8xf32> -> vector<16x8xf32>
    %c0_52 = arith.constant 0 : index
    %c1_53 = arith.constant 1 : index
    %c0_54 = arith.constant 0 : index
    %c0_55 = arith.constant 0 : index
    %54 = vector.load %arg3[%c0_52, %c1_53, %c0_54, %c0_55] : memref<3x4x1x8xf32, #tpu.memory_space<vmem>>, vector<1x1x1x8xf32>
    %55 = vector.shape_cast %54 : vector<1x1x1x8xf32> to vector<1x8xf32>
    %56 = vector.broadcast %55 : vector<1x8xf32> to vector<16x8xf32>
    %57 = arith.addf %53, %56 : vector<16x8xf32>
    %cst_56 = arith.constant dense<0.000000e+00> : vector<16x8xf32>
    %58 = tpu.matmul %0, %50, %cst_56 {dimension_numbers = #tpu.dot_dimension_numbers<[1], [0], [0], [1], [0, 0, 1, 1], [], []>} : vector<16x32xf32>, vector<32x8xf32>, vector<16x8xf32> -> vector<16x8xf32>
    %c1_57 = arith.constant 1 : index
    %c1_58 = arith.constant 1 : index
    %c0_59 = arith.constant 0 : index
    %c0_60 = arith.constant 0 : index
    %59 = vector.load %arg3[%c1_57, %c1_58, %c0_59, %c0_60] : memref<3x4x1x8xf32, #tpu.memory_space<vmem>>, vector<1x1x1x8xf32>
    %60 = vector.shape_cast %59 : vector<1x1x1x8xf32> to vector<1x8xf32>
    %61 = vector.broadcast %60 : vector<1x8xf32> to vector<16x8xf32>
    %62 = arith.addf %58, %61 : vector<16x8xf32>
    %cst_61 = arith.constant dense<0.000000e+00> : vector<16x8xf32>
    %63 = tpu.matmul %0, %52, %cst_61 {dimension_numbers = #tpu.dot_dimension_numbers<[1], [0], [0], [1], [0, 0, 1, 1], [], []>} : vector<16x32xf32>, vector<32x8xf32>, vector<16x8xf32> -> vector<16x8xf32>
    %c2_62 = arith.constant 2 : index
    %c1_63 = arith.constant 1 : index
    %c0_64 = arith.constant 0 : index
    %c0_65 = arith.constant 0 : index
    %64 = vector.load %arg3[%c2_62, %c1_63, %c0_64, %c0_65] : memref<3x4x1x8xf32, #tpu.memory_space<vmem>>, vector<1x1x1x8xf32>
    %65 = vector.shape_cast %64 : vector<1x1x1x8xf32> to vector<1x8xf32>
    %66 = vector.broadcast %65 : vector<1x8xf32> to vector<16x8xf32>
    %67 = arith.addf %63, %66 : vector<16x8xf32>
    %cst_66 = arith.constant dense<0.000000e+00> : vector<16x16xf32>
    %68 = tpu.matmul %57, %62, %cst_66 {dimension_numbers = #tpu.dot_dimension_numbers<[1], [1], [0], [0], [0, 0, 1, 0], [], []>} : vector<16x8xf32>, vector<16x8xf32>, vector<16x16xf32> -> vector<16x16xf32>
    %cst_67 = arith.constant 0.353553385 : f32
    %69 = vector.broadcast %cst_67 : f32 to vector<16x16xf32>
    %70 = arith.mulf %68, %69 : vector<16x16xf32>
    %cst_68 = arith.constant 0.000000e+00 : f32
    %71 = vector.broadcast %cst_68 : f32 to vector<16x16xf32>
    %72 = arith.cmpf oeq, %70, %71 : vector<16x16xf32>
    %cst_69 = arith.constant 0xFF800000 : f32
    %73 = vector.broadcast %cst_69 : f32 to vector<16x16xf32>
    %74 = arith.select %72, %73, %70 : vector<16x16xi1>, vector<16x16xf32>
    %75 = arith.addf %74, %1 : vector<16x16xf32>
    %cst_70 = arith.constant dense<0xFF800000> : vector<16xf32>
    %76 = vector.multi_reduction <maximumf>, %75, %cst_70 [1] : vector<16x16xf32> to vector<16xf32>
    %77 = vector.shape_cast %76 : vector<16xf32> to vector<16x1xf32>
    %78 = vector.broadcast %77 : vector<16x1xf32> to vector<16x16xf32>
    %79 = arith.subf %75, %78 : vector<16x16xf32>
    %80 = math.exp %79 : vector<16x16xf32>
    %cst_71 = arith.constant dense<0.000000e+00> : vector<16xf32>
    %81 = vector.multi_reduction <add>, %80, %cst_71 [1] : vector<16x16xf32> to vector<16xf32>
    %82 = vector.shape_cast %81 : vector<16xf32> to vector<16x1xf32>
    %83 = tpu.reciprocal %82 {approx = true} : vector<16x1xf32> -> vector<16x1xf32>
    %84 = vector.broadcast %83 : vector<16x1xf32> to vector<16x16xf32>
    %85 = arith.mulf %80, %84 : vector<16x16xf32>
    %cst_72 = arith.constant dense<0.000000e+00> : vector<16x8xf32>
    %86 = tpu.matmul %85, %67, %cst_72 {dimension_numbers = #tpu.dot_dimension_numbers<[1], [0], [0], [1], [0, 0, 1, 1], [], []>} : vector<16x16xf32>, vector<16x8xf32>, vector<16x8xf32> -> vector<16x8xf32>
    %c1_73 = arith.constant 1 : index
    %c0_74 = arith.constant 0 : index
    %c0_75 = arith.constant 0 : index
    %87 = vector.load %arg5[%c1_73, %c0_74, %c0_75] : memref<4x8x32xf32, #tpu.memory_space<vmem>>, vector<1x8x32xf32>
    %88 = vector.shape_cast %87 : vector<1x8x32xf32> to vector<8x32xf32>
    %cst_76 = arith.constant dense<0.000000e+00> : vector<16x32xf32>
    %89 = tpu.matmul %86, %88, %cst_76 {dimension_numbers = #tpu.dot_dimension_numbers<[1], [0], [0], [1], [0, 0, 1, 1], [], []>} : vector<16x8xf32>, vector<8x32xf32>, vector<16x32xf32> -> vector<16x32xf32>
    %90 = arith.addf %46, %89 : vector<16x32xf32>
    %c0_77 = arith.constant 0 : index
    %c2_78 = arith.constant 2 : index
    %c0_79 = arith.constant 0 : index
    %c0_80 = arith.constant 0 : index
    %91 = vector.load %arg2[%c0_77, %c2_78, %c0_79, %c0_80] : memref<3x4x32x8xf32, #tpu.memory_space<vmem>>, vector<1x1x32x8xf32>
    %92 = vector.shape_cast %91 : vector<1x1x32x8xf32> to vector<32x8xf32>
    %c1_81 = arith.constant 1 : index
    %c2_82 = arith.constant 2 : index
    %c0_83 = arith.constant 0 : index
    %c0_84 = arith.constant 0 : index
    %93 = vector.load %arg2[%c1_81, %c2_82, %c0_83, %c0_84] : memref<3x4x32x8xf32, #tpu.memory_space<vmem>>, vector<1x1x32x8xf32>
    %94 = vector.shape_cast %93 : vector<1x1x32x8xf32> to vector<32x8xf32>
    %c2_85 = arith.constant 2 : index
    %c2_86 = arith.constant 2 : index
    %c0_87 = arith.constant 0 : index
    %c0_88 = arith.constant 0 : index
    %95 = vector.load %arg2[%c2_85, %c2_86, %c0_87, %c0_88] : memref<3x4x32x8xf32, #tpu.memory_space<vmem>>, vector<1x1x32x8xf32>
    %96 = vector.shape_cast %95 : vector<1x1x32x8xf32> to vector<32x8xf32>
    %cst_89 = arith.constant dense<0.000000e+00> : vector<16x8xf32>
    %97 = tpu.matmul %0, %92, %cst_89 {dimension_numbers = #tpu.dot_dimension_numbers<[1], [0], [0], [1], [0, 0, 1, 1], [], []>} : vector<16x32xf32>, vector<32x8xf32>, vector<16x8xf32> -> vector<16x8xf32>
    %c0_90 = arith.constant 0 : index
    %c2_91 = arith.constant 2 : index
    %c0_92 = arith.constant 0 : index
    %c0_93 = arith.constant 0 : index
    %98 = vector.load %arg3[%c0_90, %c2_91, %c0_92, %c0_93] : memref<3x4x1x8xf32, #tpu.memory_space<vmem>>, vector<1x1x1x8xf32>
    %99 = vector.shape_cast %98 : vector<1x1x1x8xf32> to vector<1x8xf32>
    %100 = vector.broadcast %99 : vector<1x8xf32> to vector<16x8xf32>
    %101 = arith.addf %97, %100 : vector<16x8xf32>
    %cst_94 = arith.constant dense<0.000000e+00> : vector<16x8xf32>
    %102 = tpu.matmul %0, %94, %cst_94 {dimension_numbers = #tpu.dot_dimension_numbers<[1], [0], [0], [1], [0, 0, 1, 1], [], []>} : vector<16x32xf32>, vector<32x8xf32>, vector<16x8xf32> -> vector<16x8xf32>
    %c1_95 = arith.constant 1 : index
    %c2_96 = arith.constant 2 : index
    %c0_97 = arith.constant 0 : index
    %c0_98 = arith.constant 0 : index
    %103 = vector.load %arg3[%c1_95, %c2_96, %c0_97, %c0_98] : memref<3x4x1x8xf32, #tpu.memory_space<vmem>>, vector<1x1x1x8xf32>
    %104 = vector.shape_cast %103 : vector<1x1x1x8xf32> to vector<1x8xf32>
    %105 = vector.broadcast %104 : vector<1x8xf32> to vector<16x8xf32>
    %106 = arith.addf %102, %105 : vector<16x8xf32>
    %cst_99 = arith.constant dense<0.000000e+00> : vector<16x8xf32>
    %107 = tpu.matmul %0, %96, %cst_99 {dimension_numbers = #tpu.dot_dimension_numbers<[1], [0], [0], [1], [0, 0, 1, 1], [], []>} : vector<16x32xf32>, vector<32x8xf32>, vector<16x8xf32> -> vector<16x8xf32>
    %c2_100 = arith.constant 2 : index
    %c2_101 = arith.constant 2 : index
    %c0_102 = arith.constant 0 : index
    %c0_103 = arith.constant 0 : index
    %108 = vector.load %arg3[%c2_100, %c2_101, %c0_102, %c0_103] : memref<3x4x1x8xf32, #tpu.memory_space<vmem>>, vector<1x1x1x8xf32>
    %109 = vector.shape_cast %108 : vector<1x1x1x8xf32> to vector<1x8xf32>
    %110 = vector.broadcast %109 : vector<1x8xf32> to vector<16x8xf32>
    %111 = arith.addf %107, %110 : vector<16x8xf32>
    %cst_104 = arith.constant dense<0.000000e+00> : vector<16x16xf32>
    %112 = tpu.matmul %101, %106, %cst_104 {dimension_numbers = #tpu.dot_dimension_numbers<[1], [1], [0], [0], [0, 0, 1, 0], [], []>} : vector<16x8xf32>, vector<16x8xf32>, vector<16x16xf32> -> vector<16x16xf32>
    %cst_105 = arith.constant 0.353553385 : f32
    %113 = vector.broadcast %cst_105 : f32 to vector<16x16xf32>
    %114 = arith.mulf %112, %113 : vector<16x16xf32>
    %cst_106 = arith.constant 0.000000e+00 : f32
    %115 = vector.broadcast %cst_106 : f32 to vector<16x16xf32>
    %116 = arith.cmpf oeq, %114, %115 : vector<16x16xf32>
    %cst_107 = arith.constant 0xFF800000 : f32
    %117 = vector.broadcast %cst_107 : f32 to vector<16x16xf32>
    %118 = arith.select %116, %117, %114 : vector<16x16xi1>, vector<16x16xf32>
    %119 = arith.addf %118, %1 : vector<16x16xf32>
    %cst_108 = arith.constant dense<0xFF800000> : vector<16xf32>
    %120 = vector.multi_reduction <maximumf>, %119, %cst_108 [1] : vector<16x16xf32> to vector<16xf32>
    %121 = vector.shape_cast %120 : vector<16xf32> to vector<16x1xf32>
    %122 = vector.broadcast %121 : vector<16x1xf32> to vector<16x16xf32>
    %123 = arith.subf %119, %122 : vector<16x16xf32>
    %124 = math.exp %123 : vector<16x16xf32>
    %cst_109 = arith.constant dense<0.000000e+00> : vector<16xf32>
    %125 = vector.multi_reduction <add>, %124, %cst_109 [1] : vector<16x16xf32> to vector<16xf32>
    %126 = vector.shape_cast %125 : vector<16xf32> to vector<16x1xf32>
    %127 = tpu.reciprocal %126 {approx = true} : vector<16x1xf32> -> vector<16x1xf32>
    %128 = vector.broadcast %127 : vector<16x1xf32> to vector<16x16xf32>
    %129 = arith.mulf %124, %128 : vector<16x16xf32>
    %cst_110 = arith.constant dense<0.000000e+00> : vector<16x8xf32>
    %130 = tpu.matmul %129, %111, %cst_110 {dimension_numbers = #tpu.dot_dimension_numbers<[1], [0], [0], [1], [0, 0, 1, 1], [], []>} : vector<16x16xf32>, vector<16x8xf32>, vector<16x8xf32> -> vector<16x8xf32>
    %c2_111 = arith.constant 2 : index
    %c0_112 = arith.constant 0 : index
    %c0_113 = arith.constant 0 : index
    %131 = vector.load %arg5[%c2_111, %c0_112, %c0_113] : memref<4x8x32xf32, #tpu.memory_space<vmem>>, vector<1x8x32xf32>
    %132 = vector.shape_cast %131 : vector<1x8x32xf32> to vector<8x32xf32>
    %cst_114 = arith.constant dense<0.000000e+00> : vector<16x32xf32>
    %133 = tpu.matmul %130, %132, %cst_114 {dimension_numbers = #tpu.dot_dimension_numbers<[1], [0], [0], [1], [0, 0, 1, 1], [], []>} : vector<16x8xf32>, vector<8x32xf32>, vector<16x32xf32> -> vector<16x32xf32>
    %134 = arith.addf %90, %133 : vector<16x32xf32>
    %c0_115 = arith.constant 0 : index
    %c3 = arith.constant 3 : index
    %c0_116 = arith.constant 0 : index
    %c0_117 = arith.constant 0 : index
    %135 = vector.load %arg2[%c0_115, %c3, %c0_116, %c0_117] : memref<3x4x32x8xf32, #tpu.memory_space<vmem>>, vector<1x1x32x8xf32>
    %136 = vector.shape_cast %135 : vector<1x1x32x8xf32> to vector<32x8xf32>
    %c1_118 = arith.constant 1 : index
    %c3_119 = arith.constant 3 : index
    %c0_120 = arith.constant 0 : index
    %c0_121 = arith.constant 0 : index
    %137 = vector.load %arg2[%c1_118, %c3_119, %c0_120, %c0_121] : memref<3x4x32x8xf32, #tpu.memory_space<vmem>>, vector<1x1x32x8xf32>
    %138 = vector.shape_cast %137 : vector<1x1x32x8xf32> to vector<32x8xf32>
    %c2_122 = arith.constant 2 : index
    %c3_123 = arith.constant 3 : index
    %c0_124 = arith.constant 0 : index
    %c0_125 = arith.constant 0 : index
    %139 = vector.load %arg2[%c2_122, %c3_123, %c0_124, %c0_125] : memref<3x4x32x8xf32, #tpu.memory_space<vmem>>, vector<1x1x32x8xf32>
    %140 = vector.shape_cast %139 : vector<1x1x32x8xf32> to vector<32x8xf32>
    %cst_126 = arith.constant dense<0.000000e+00> : vector<16x8xf32>
    %141 = tpu.matmul %0, %136, %cst_126 {dimension_numbers = #tpu.dot_dimension_numbers<[1], [0], [0], [1], [0, 0, 1, 1], [], []>} : vector<16x32xf32>, vector<32x8xf32>, vector<16x8xf32> -> vector<16x8xf32>
    %c0_127 = arith.constant 0 : index
    %c3_128 = arith.constant 3 : index
    %c0_129 = arith.constant 0 : index
    %c0_130 = arith.constant 0 : index
    %142 = vector.load %arg3[%c0_127, %c3_128, %c0_129, %c0_130] : memref<3x4x1x8xf32, #tpu.memory_space<vmem>>, vector<1x1x1x8xf32>
    %143 = vector.shape_cast %142 : vector<1x1x1x8xf32> to vector<1x8xf32>
    %144 = vector.broadcast %143 : vector<1x8xf32> to vector<16x8xf32>
    %145 = arith.addf %141, %144 : vector<16x8xf32>
    %cst_131 = arith.constant dense<0.000000e+00> : vector<16x8xf32>
    %146 = tpu.matmul %0, %138, %cst_131 {dimension_numbers = #tpu.dot_dimension_numbers<[1], [0], [0], [1], [0, 0, 1, 1], [], []>} : vector<16x32xf32>, vector<32x8xf32>, vector<16x8xf32> -> vector<16x8xf32>
    %c1_132 = arith.constant 1 : index
    %c3_133 = arith.constant 3 : index
    %c0_134 = arith.constant 0 : index
    %c0_135 = arith.constant 0 : index
    %147 = vector.load %arg3[%c1_132, %c3_133, %c0_134, %c0_135] : memref<3x4x1x8xf32, #tpu.memory_space<vmem>>, vector<1x1x1x8xf32>
    %148 = vector.shape_cast %147 : vector<1x1x1x8xf32> to vector<1x8xf32>
    %149 = vector.broadcast %148 : vector<1x8xf32> to vector<16x8xf32>
    %150 = arith.addf %146, %149 : vector<16x8xf32>
    %cst_136 = arith.constant dense<0.000000e+00> : vector<16x8xf32>
    %151 = tpu.matmul %0, %140, %cst_136 {dimension_numbers = #tpu.dot_dimension_numbers<[1], [0], [0], [1], [0, 0, 1, 1], [], []>} : vector<16x32xf32>, vector<32x8xf32>, vector<16x8xf32> -> vector<16x8xf32>
    %c2_137 = arith.constant 2 : index
    %c3_138 = arith.constant 3 : index
    %c0_139 = arith.constant 0 : index
    %c0_140 = arith.constant 0 : index
    %152 = vector.load %arg3[%c2_137, %c3_138, %c0_139, %c0_140] : memref<3x4x1x8xf32, #tpu.memory_space<vmem>>, vector<1x1x1x8xf32>
    %153 = vector.shape_cast %152 : vector<1x1x1x8xf32> to vector<1x8xf32>
    %154 = vector.broadcast %153 : vector<1x8xf32> to vector<16x8xf32>
    %155 = arith.addf %151, %154 : vector<16x8xf32>
    %cst_141 = arith.constant dense<0.000000e+00> : vector<16x16xf32>
    %156 = tpu.matmul %145, %150, %cst_141 {dimension_numbers = #tpu.dot_dimension_numbers<[1], [1], [0], [0], [0, 0, 1, 0], [], []>} : vector<16x8xf32>, vector<16x8xf32>, vector<16x16xf32> -> vector<16x16xf32>
    %cst_142 = arith.constant 0.353553385 : f32
    %157 = vector.broadcast %cst_142 : f32 to vector<16x16xf32>
    %158 = arith.mulf %156, %157 : vector<16x16xf32>
    %cst_143 = arith.constant 0.000000e+00 : f32
    %159 = vector.broadcast %cst_143 : f32 to vector<16x16xf32>
    %160 = arith.cmpf oeq, %158, %159 : vector<16x16xf32>
    %cst_144 = arith.constant 0xFF800000 : f32
    %161 = vector.broadcast %cst_144 : f32 to vector<16x16xf32>
    %162 = arith.select %160, %161, %158 : vector<16x16xi1>, vector<16x16xf32>
    %163 = arith.addf %162, %1 : vector<16x16xf32>
    %cst_145 = arith.constant dense<0xFF800000> : vector<16xf32>
    %164 = vector.multi_reduction <maximumf>, %163, %cst_145 [1] : vector<16x16xf32> to vector<16xf32>
    %165 = vector.shape_cast %164 : vector<16xf32> to vector<16x1xf32>
    %166 = vector.broadcast %165 : vector<16x1xf32> to vector<16x16xf32>
    %167 = arith.subf %163, %166 : vector<16x16xf32>
    %168 = math.exp %167 : vector<16x16xf32>
    %cst_146 = arith.constant dense<0.000000e+00> : vector<16xf32>
    %169 = vector.multi_reduction <add>, %168, %cst_146 [1] : vector<16x16xf32> to vector<16xf32>
    %170 = vector.shape_cast %169 : vector<16xf32> to vector<16x1xf32>
    %171 = tpu.reciprocal %170 {approx = true} : vector<16x1xf32> -> vector<16x1xf32>
    %172 = vector.broadcast %171 : vector<16x1xf32> to vector<16x16xf32>
    %173 = arith.mulf %168, %172 : vector<16x16xf32>
    %cst_147 = arith.constant dense<0.000000e+00> : vector<16x8xf32>
    %174 = tpu.matmul %173, %155, %cst_147 {dimension_numbers = #tpu.dot_dimension_numbers<[1], [0], [0], [1], [0, 0, 1, 1], [], []>} : vector<16x16xf32>, vector<16x8xf32>, vector<16x8xf32> -> vector<16x8xf32>
    %c3_148 = arith.constant 3 : index
    %c0_149 = arith.constant 0 : index
    %c0_150 = arith.constant 0 : index
    %175 = vector.load %arg5[%c3_148, %c0_149, %c0_150] : memref<4x8x32xf32, #tpu.memory_space<vmem>>, vector<1x8x32xf32>
    %176 = vector.shape_cast %175 : vector<1x8x32xf32> to vector<8x32xf32>
    %cst_151 = arith.constant dense<0.000000e+00> : vector<16x32xf32>
    %177 = tpu.matmul %174, %176, %cst_151 {dimension_numbers = #tpu.dot_dimension_numbers<[1], [0], [0], [1], [0, 0, 1, 1], [], []>} : vector<16x8xf32>, vector<8x32xf32>, vector<16x32xf32> -> vector<16x32xf32>
    %178 = arith.addf %134, %177 : vector<16x32xf32>
    %c0_152 = arith.constant 0 : index
    %c0_153 = arith.constant 0 : index
    %179 = vector.load %arg6[%c0_152, %c0_153] : memref<1x32xf32, #tpu.memory_space<vmem>>, vector<1x32xf32>
    %180 = vector.broadcast %179 : vector<1x32xf32> to vector<16x32xf32>
    %181 = arith.addf %178, %180 : vector<16x32xf32>
    %c0_154 = arith.constant 0 : index
    %c0_155 = arith.constant 0 : index
    %182 = vector.load %arg7[%c0_154, %c0_155] : memref<16x32xf32, #tpu.memory_space<vmem>>, vector<16x32xf32>
    tpu.vector_store %arg7[%c0_154, %c0_155], %181 {strides = array<i32>} : memref<16x32xf32, #tpu.memory_space<vmem>>, vector<16x32xf32>,
    return
  }
  func.func @transform_0(%arg0: i32) -> (i32, i32) {
    %c0_i32 = arith.constant 0 : i32
    %c0_i32_0 = arith.constant 0 : i32
    %c0_i32_1 = arith.constant 0 : i32
    return %c0_i32, %c0_i32_0 : i32, i32
  }
  func.func @transform_1(%arg0: i32) -> (i32, i32, i32, i32) {
    %c0_i32 = arith.constant 0 : i32
    %c0_i32_0 = arith.constant 0 : i32
    %c0_i32_1 = arith.constant 0 : i32
    %c0_i32_2 = arith.constant 0 : i32
    %c0_i32_3 = arith.constant 0 : i32
    return %c0_i32, %c0_i32_0, %c0_i32_1, %c0_i32_2 : i32, i32, i32, i32
  }
  func.func @transform_2(%arg0: i32) -> (i32, i32, i32, i32) {
    %c0_i32 = arith.constant 0 : i32
    %c0_i32_0 = arith.constant 0 : i32
    %c0_i32_1 = arith.constant 0 : i32
    %c0_i32_2 = arith.constant 0 : i32
    %c0_i32_3 = arith.constant 0 : i32
    return %c0_i32, %c0_i32_0, %c0_i32_1, %c0_i32_2 : i32, i32, i32, i32
  }
  func.func @transform_3(%arg0: i32) -> (i32, i32) {
    %c0_i32 = arith.constant 0 : i32
    %c0_i32_0 = arith.constant 0 : i32
    %c0_i32_1 = arith.constant 0 : i32
    return %c0_i32, %c0_i32_0 : i32, i32
  }
  func.func @transform_4(%arg0: i32) -> (i32, i32, i32) {
    %c0_i32 = arith.constant 0 : i32
    %c0_i32_0 = arith.constant 0 : i32
    %c0_i32_1 = arith.constant 0 : i32
    %c0_i32_2 = arith.constant 0 : i32
    return %c0_i32, %c0_i32_0, %c0_i32_1 : i32, i32, i32
  }
  func.func @transform_5(%arg0: i32) -> (i32, i32) {
    %c0_i32 = arith.constant 0 : i32
    %c0_i32_0 = arith.constant 0 : i32
    %c0_i32_1 = arith.constant 0 : i32
    return %c0_i32, %c0_i32_0 : i32, i32
  }
  func.func @transform_6(%arg0: i32) -> (i32, i32) {
    %c0_i32 = arith.constant 0 : i32
    %c0_i32_0 = arith.constant 0 : i32
    %c0_i32_1 = arith.constant 0 : i32
    return %c0_i32, %c0_i32_0 : i32, i32
  }
}

</mosaic_0001>

<bundles_post_ra>
// kernel: multihead_attention_forward.1
= control target key start
LH: loop header
LB: loop body
LE: loop exit
PB: predicated region body
PF: predicated region fallthrough
CT: control target
= control target key end

     0   :  { %vm49_vm0 = vcmask 261120   ;;  %s3288_s0 = inlined_call_operand.vmem [shape: f32[16,32], index: 0, kind: input, shape index: {}]   ;;  %s3289_s1 = inlined_call_operand.vmem [shape: f32[3,4,32,8], index: 1, kind: input, shape index: {}]   ;;  %s3290_s2 = inlined_call_operand.vmem [shape: f32[3,4,1,8], index: 2, kind: input, shape index: {}]   ;;  %s3291_s3 = inlined_call_operand.vmem [shape: f32[16,16], index: 3, kind: input, shape index: {}]   ;;  %s3292_s4 = inlined_call_operand.vmem [shape: f32[4,8,32], index: 4, kind: input, shape index: {}]   ;;  %s3293_s5 = inlined_call_operand.vmem [shape: f32[1,32], index: 5, kind: input, shape index: {}]   ;;  %s3294_s6 = inlined_call_operand.hbm [shape: f32[16,32], index: 6, kind: output, shape index: {}]  }
   0x1   :  { %v2245_v0 = vld [vmem:[%s3289_s1 + $0x80] sm:$0xff]  ;;  %v2246_v1 = vld [vmem:[%s3289_s1 + $0x88] sm:$0xff]  ;;  %v2247_v2 = vld [vmem:[%s3289_s1 + $0x90] sm:$0xff] }
   0x2   :  { %v2704_v3 = vpack.c.bf16 %v2246_v1, %v2245_v0  ;;  %v2248_v4 = vld [vmem:[%s3289_s1 + $0x98] sm:$0xff]  ;;  %v2950_v5 = vld [vmem:[%s3288_s0] sm:$0xff]  ;;  %v29_v8 = vld [vmem:[%s3289_s1 + $0x8] sm:$0xff] }
   0x3   :  { %v28_v6 = vld [vmem:[%s3289_s1] sm:$0xff]  ;;  %v2708_v7 = vpack.c.bf16 %v2248_v4, %v2247_v2  ;;  %2507 = vmatprep.mubr.msk.f32.mxu1 %vm49_vm0, %v2950_v5  ;;  %v30_v9 = vld [vmem:[%s3289_s1 + $0x10] sm:$0xff]  ;;  %2496 = vmatprep.mubr.msk.f32.mxu0 %vm49_vm0, %v2950_v5  ;;  %v31_v11 = vld [vmem:[%s3289_s1 + $0x18] sm:$0xff] }
   0x4   :  { %2705 = vmatprep.subr.bf16.mxu1 %v2704_v3  ;;  %v2696_v10 = vpack.c.bf16 %v29_v8, %v28_v6 }
   0x5   :  { %11 = vsyncpa [#allocation3], 0  ;;  %2707 = vmatpush3.bf16.msra.mxu1 %v2704_v3  ;;  %v2700_v12 = vpack.c.bf16 %v31_v11, %v30_v9  ;;  %v2971_v13 = vld [vmem:[%s3288_s0 + $0x8] sm:$0xff]  ;;  %v2257_v14 = vld [vmem:[%s3290_s2 + $0x4] ss:$0 sm:$0xff]  ;;  %vm297_vm1 = vcmask 64512  }
   0x6   :  { %2709 = vmatprep.subr.bf16.mxu1 %v2708_v7  ;;  %2697 = vmatprep.subr.bf16.mxu0 %v2696_v10  ;;  %v2253_v18 = vld [vmem:[%s3290_s2] ss:$0 sm:$0xff]  ;;  %vm2987_vm2 = vmpackc.low %vm297_vm1, %vm297_vm1  ;;  %v2250_v27 = vld [vmem:[%s3289_s1 + $0x108] sm:$0xff]  ;;  %vm393_vm5 = vcmask 130048   ;;  %s2897_s27 = smov [#allocation2]  }
   0x7   :  { %2699 = vmatpush3.bf16.msra.mxu0 %v2696_v10  ;;  %v2249_v26 = vld [vmem:[%s3289_s1 + $0x100] sm:$0xff]  ;;  %v2251_v28 = vld [vmem:[%s3289_s1 + $0x110] sm:$0xff]  ;;  %v2252_v30 = vld [vmem:[%s3289_s1 + $0x118] sm:$0xff]  ;;  %s2234_s28 = sshll.u32 %s2897_s27, 4  ;;  %s2235_s28 = int_to_ptr.vmem [resolvable:$true] %s2234_s28 }
   0x8   :  { %2701 = vmatprep.subr.bf16.mxu0 %v2700_v12  ;;  %v2712_v29 = vpack.c.bf16 %v2250_v27, %v2249_v26  ;;  %v2716_v31 = vpack.c.bf16 %v2252_v30, %v2251_v28  ;;  %v3016_v36 = vld [vmem:[%s3291_s3] sm:$0xff]  ;;  %v3021_v39 = vld [vmem:[%s3291_s3 + $0x8] sm:$0xff]  ;;  %v2276_v62 = vld [vmem:[%s3289_s1 + $0xb0] sm:$0xff]  ;;  %s2873_s29 = scalar_lea.vmem %s2235_s28, 256  ;;  %p2878_p1 = scmp.lt.s32.totalorder %s2235_s28, %s2235_s28 }
   0x9   :  { %2711 = vmatpush3.bf16.msra.mxu1 %v2708_v7  ;;  %v2274_v54 = vld [vmem:[%s3289_s1 + $0xa0] sm:$0xff]  ;;  %v2275_v55 = vld [vmem:[%s3289_s1 + $0xa8] sm:$0xff]  ;;  %v2277_v63 = vld [vmem:[%s3289_s1 + $0xb8] sm:$0xff]  ;;  %p2874_p0 = scmp.ne.s32.totalorder %s2235_s28, %s2873_s29  ;;  %p2879_p2 = scmp.lt.s32.totalorder %s2873_s29, %s2873_s29 }
   0xa   :  { %v2738_v56 = vpack.c.bf16 %v2275_v55, %v2274_v54  ;;  %v2261_v58 = vld [vmem:[%s3290_s2 + $0x8] ss:$0 sm:$0xff]  ;;  %v2742_v0 = vpack.c.bf16 %v2277_v63, %v2276_v62  ;;  %v2270_v2 = vld [vmem:[%s3289_s1 + $0x20] sm:$0xff]  ;;  %v2272_v10 = vld [vmem:[%s3289_s1 + $0x30] sm:$0xff] }
   0xb   :  { %2703 = vmatpush3.bf16.msra.mxu0 %v2700_v12  ;;  %v2271_v3 = vld [vmem:[%s3289_s1 + $0x28] sm:$0xff]  ;;  %v2273_v11 = vld [vmem:[%s3289_s1 + $0x38] sm:$0xff]  ;;  %v2278_v30 = vld [vmem:[%s3289_s1 + $0x120] sm:$0xff]  ;;  %p2880_p3 = por %p2879_p2, %p2878_p1 }
   0xc   :  { %2508 = vmatmul.mubr.msk.f32.vlgmr.msra.gmra.mrb[0].mxu1 %vm49_vm0, %v2971_v13  ;;  %2713 = vmatprep.subr.bf16.mxu0 %v2712_v29  ;;  %v2730_v4 = vpack.c.bf16 %v2271_v3, %v2270_v2  ;;  %v2349_v21 = vld [vmem:[%s3289_s1 + $0x178] sm:$0xff] }
   0xd   :  { %p2881_p4 = pnand %p2880_p3, %p2874_p0 }
   0xe   :  { %2497 = vmatmul.mubr.msk.f32.vlgmr.msra.gmra.mrb[0].mxu0 %vm49_vm0, %v2971_v13 }
   0xf   :  { %2518 = vmatprep.mubr.msk.f32.mxu0 %vm49_vm0, %v2950_v5  ;;  %2715 = vmatpush3.bf16.msra.mxu0 %v2712_v29 }
  0x10   :  { %2717 = vmatprep.subr.bf16.mxu0 %v2716_v31 }
  0x13   :  { %2719 = vmatpush3.bf16.msra.mxu0 %v2716_v31  ;;  %v2279_v31 = vld [vmem:[%s3289_s1 + $0x128] sm:$0xff] }
  0x14   :  { %2739 = vmatprep.subr.bf16.mxu0 %v2738_v56 }
  0x16   :  { %2519 = vmatmul.mubr.msk.f32.vlgmr.msra.gmra.mrb[2].mxu0 %vm49_vm0, %v2971_v13 }
  0x17   :  { %2554 = vmatprep.mubr.msk.f32.mxu0 %vm49_vm0, %v2950_v5  ;;  %2741 = vmatpush3.bf16.msra.mxu0 %v2738_v56 }
  0x18   :  { %2743 = vmatprep.subr.bf16.mxu0 %v2742_v0 }
  0x1b   :  { %2745 = vmatpush3.bf16.msra.mxu0 %v2742_v0  ;;  %v2300_v0 = vld [vmem:[%s3292_s4 + $0x8] sm:$0xff] }
  0x1e   :  { %2555 = vmatmul.mubr.msk.f32.vlgmr.msra.gmra.mrb[4].mxu0 %vm49_vm0, %v2971_v13 }
  0xdf   :  { %v2509_v15 = vpop.f32.mrb[0].mxu1 }
  0xe0   :  { %v211_v16 = vadd.f32 %v2509_v15, %v2257_v14  ;;  %v205_v17 = vpop.f32.mrb[1].mxu1  ;;  %v2734_v15 = vpack.c.bf16 %v2273_v11, %v2272_v10  ;;  %v2306_v10 = vld [vmem:[%s3289_s1 + $0x48] sm:$0xff] }
  0xe1   :  { %v206_v19 = vadd.f32 %v2257_v14, %v205_v17  ;;  %v2498_v20 = vpop.f32.mrb[0].mxu0 }
  0xe2   :  { %v122_v22 = vpop.f32.mrb[1].mxu0  ;;  %v128_v25 = vadd.f32 %v2498_v20, %v2253_v18 }
  0xe3   :  { %v2720_v23 = vpack.c.bf16 %v211_v16, %v206_v19  ;;  %v123_v24 = vadd.f32 %v2253_v18, %v122_v22  ;;  %v2287_v16 = vld [vmem:[%s3290_s2 + $0x5] ss:$0 sm:$0xff] }
  0xe5   :  { %2722 = vmatprep.subr.msk.bf16.mxu1 %vm2987_vm2, %v2720_v23  ;;  %2525 = vmatprep.mubr.msk.f32.mxu1 %vm297_vm1, %v123_v24 }
  0xe6   :  { %2725 = vmatpush3.bf16.xpose.msk.msra.mxu1 %vm2987_vm2, %v2720_v23 }
  0xe9   :  { %v2520_v57 = vpop.f32.mrb[2].mxu0 }
  0xea   :  { %v288_v59 = vpop.f32.mrb[3].mxu0  ;;  %v294_v60 = vadd.f32 %v2520_v57, %v2261_v58 }
  0xeb   :  { %v289_v61 = vadd.f32 %v2261_v58, %v288_v59  ;;  %v2291_v59 = vld [vmem:[%s3290_s2 + $0x9] ss:$0 sm:$0xff] }
  0xed   :  { %2526 = vmatmul.mubr.msk.f32.vlgmr.msra.gmra.mrb[2].mxu1 %vm297_vm1, %v128_v25  ;;  %v2726_v1 = vpack.c.bf16 %v294_v60, %v289_v61  ;;  %v2283_v25 = vld [vmem:[%s3290_s2 + $0x1] ss:$0 sm:$0xff] }
  0xef   :  { %2727 = vmatprep.subr.bf16.mxu1 %v2726_v1 }
  0xf0   :  { %2729 = vmatpush3.bf16.msra.mxu1 %v2726_v1 }
  0xf1   :  { %2731 = vmatprep.subr.bf16.mxu1 %v2730_v4  ;;  %v2556_v17 = vpop.f32.mrb[4].mxu0 }
  0xf2   :  { %v676_v18 = vadd.f32 %v2556_v17, %v2287_v16  ;;  %v670_v19 = vpop.f32.mrb[5].mxu0  ;;  %v2310_v17 = vld [vmem:[%s3289_s1 + $0xc8] sm:$0xff] }
  0xf3   :  { %v671_v20 = vadd.f32 %v2287_v16, %v670_v19  ;;  %v2309_v16 = vld [vmem:[%s3289_s1 + $0xc0] sm:$0xff] }
  0xf5   :  { %v2754_v22 = vpack.c.bf16 %v676_v18, %v671_v20  ;;  %v2772_v20 = vpack.c.bf16 %v2310_v17, %v2309_v16  ;;  %v2343_v16 = vld [vmem:[%s3289_s1 + $0xe8] sm:$0xff] }
  0xf7   :  { %2756 = vmatprep.subr.msk.bf16.mxu0 %vm2987_vm2, %v2754_v22 }
  0xf8   :  { %2759 = vmatpush3.bf16.xpose.msk.msra.mxu0 %vm2987_vm2, %v2754_v22  ;;  %v2311_v22 = vld [vmem:[%s3289_s1 + $0xd0] sm:$0xff] }
  0xf9   :  { %2582 = vmatprep.subr.mxu0 %v2300_v0 }
 0x1c0   :  { %v2527_v32 = vpop.f32.mrb[2].mxu1 }
 0x1c1   :  { %v386_v33 = vmul.f32 0.35355338, %v2527_v32  ;;  %v376_v34 = vpop.f32.mrb[3].mxu1  ;;  %v2280_v32 = vld [vmem:[%s3289_s1 + $0x130] sm:$0xff] }
 0x1c2   :  { %v385_v35 = vmul.f32 0.35355338, %v376_v34  ;;  %v2281_v34 = vld [vmem:[%s3289_s1 + $0x138] sm:$0xff] }
 0x1c3   :  { %vm388_vm3 = vcmp.eq.f32.partialorder %v386_v33, 0.0 }
 0x1c4   :  { %vm387_vm4 = vcmp.eq.f32.partialorder %v385_v35, 0.0  ;;  %v390_v37 = vsel %vm388_vm3, -inf, %v386_v33  ;;  %v2746_v33 = vpack.c.bf16 %v2279_v31, %v2278_v30 }
 0x1c5   :  { %v389_v38 = vsel %vm387_vm4, -inf, %v385_v35  ;;  %v392_v42 = vadd.f32 %v390_v37, %v3021_v39  ;;  %v2750_v35 = vpack.c.bf16 %v2281_v34, %v2280_v32 }
 0x1c6   :  { %v391_v40 = vadd.f32 %v389_v38, %v3016_v36 }
 0x1c7   :  { %v397_v43 = vsel %vm393_vm5, %v392_v42, -inf }
 0x1c8   :  { %v394_v41 = vsel %vm393_vm5, %v391_v40, -inf }
 0x1c9   :  { %395 = vmax.xlane.f32.xlu0 %v394_v41 }
 0x1cd   :  { %398 = vmax.xlane.f32.xlu0 %v397_v43 }
 0x256   :  { %v396_v44 = vpop.xlane.xlu0 %395 }
 0x257   :  { %v400_v45 = vsub.f32 %v391_v40, %v396_v44 }
 0x259   :  { %v402_v46 = vmul.f32 1.442695, %v400_v45 }
 0x25a   :  { %v399_v47 = vpop.xlane.xlu0 %398 }
 0x25b   :  { %2841 = vpow2.f32 %v402_v46  ;;  %v401_v48 = vsub.f32 %v392_v42, %v399_v47 }
 0x25d   :  { %v404_v49 = vmul.f32 1.442695, %v401_v48 }
 0x25f   :  { %2843 = vpow2.f32 %v404_v49 }
 0x265   :  { %v2842_v50 = vpop.eup %2841 }
 0x266   :  { %v406_v51 = vsel %vm393_vm5, %v2842_v50, 0.0 }
 0x267   :  { %407 = vadd.xlane.f32.xlu1 %v406_v51 }
 0x269   :  { %v2844_v52 = vpop.eup %2843 }
 0x26a   :  { %v409_v53 = vsel %vm393_vm5, %v2844_v52, 0.0 }
 0x26b   :  { %410 = vadd.xlane.f32.xlu1 %v409_v53 }
 0x2f4   :  { %v408_v6 = vpop.xlane.xlu1 %407 }
 0x2f5   :  { %2845 = vrcp.f32 %v408_v6 }
 0x2f8   :  { %v411_v7 = vpop.xlane.xlu1 %410 }
 0x2f9   :  { %2847 = vrcp.f32 %v411_v7 }
 0x2ff   :  { %v2846_v8 = vpop.eup %2845 }
 0x300   :  { %v414_v9 = vmul.f32 %v2846_v8, %v2842_v50  ;;  %v497_v8 = vld [vmem:[%s3292_s4] sm:$0xff] }
 0x302   :  { %2532 = vmatprep.mubr.msk.f32.mxu1 %vm393_vm5, %v414_v9  ;;  %v2305_v9 = vld [vmem:[%s3289_s1 + $0x40] sm:$0xff] }
 0x303   :  { %v2848_v12 = vpop.eup %2847  ;;  %v2764_v11 = vpack.c.bf16 %v2306_v10, %v2305_v9 }
 0x304   :  { %v415_v14 = vmul.f32 %v2848_v12, %v2844_v52  ;;  %v2307_v12 = vld [vmem:[%s3289_s1 + $0x50] sm:$0xff] }
 0x306   :  { %2533 = vmatmul.mubr.msk.f32.vlgmr.msra.gmra.mrb[4].mxu1 %vm393_vm5, %v415_v14  ;;  %v2308_v14 = vld [vmem:[%s3289_s1 + $0x58] sm:$0xff] }
 0x307   :  { %2733 = vmatpush3.bf16.msra.mxu1 %v2730_v4  ;;  %2543 = vmatprep.mubr.msk.f32.mxu1 %vm49_vm0, %v2950_v5 }
 0x308   :  { %2735 = vmatprep.subr.bf16.mxu1 %v2734_v15 }
 0x30b   :  { %2737 = vmatpush3.bf16.msra.mxu1 %v2734_v15  ;;  %v2768_v15 = vpack.c.bf16 %v2308_v14, %v2307_v12 }
 0x30c   :  { %2747 = vmatprep.subr.bf16.mxu1 %v2746_v33 }
 0x30e   :  { %2544 = vmatmul.mubr.msk.f32.vlgmr.msra.gmra.mrb[6].mxu1 %vm49_vm0, %v2971_v13 }
 0x30f   :  { %2565 = vmatprep.mubr.msk.f32.mxu1 %vm49_vm0, %v2950_v5  ;;  %2749 = vmatpush3.bf16.msra.mxu1 %v2746_v33 }
 0x310   :  { %2751 = vmatprep.subr.bf16.mxu1 %v2750_v35 }
 0x313   :  { %2753 = vmatpush3.bf16.msra.mxu1 %v2750_v35 }
 0x316   :  { %2566 = vmatmul.mubr.msk.f32.vlgmr.msra.gmra.mrb[8].mxu1 %vm49_vm0, %v2971_v13 }
 0x3d9   :  { %v3073_v23 = vpop.f32.mrb[4].mxu1 }
 0x3da   :  { %v3075_v24 = vpop.f32.mrb[5].mxu1 }
 0x3e1   :  { %v2545_v26 = vpop.f32.mrb[6].mxu1 }
 0x3e2   :  { %v587_v27 = vpop.f32.mrb[7].mxu1  ;;  %v593_v29 = vadd.f32 %v2545_v26, %v2283_v25 }
 0x3e3   :  { %v588_v28 = vadd.f32 %v2283_v25, %v587_v27  ;;  %v2312_v25 = vld [vmem:[%s3289_s1 + $0xd8] sm:$0xff] }
 0x3e4   :  { %v2776_v26 = vpack.c.bf16 %v2312_v25, %v2311_v22  ;;  %v2340_v22 = vld [vmem:[%s3289_s1 + $0x70] sm:$0xff]  ;;  %v2341_v25 = vld [vmem:[%s3289_s1 + $0x78] sm:$0xff] }
 0x3e5   :  { %2572 = vmatprep.mubr.msk.f32.mxu0 %vm297_vm1, %v588_v28 }
 0x3e6   :  { %2573 = vmatmul.mubr.msk.f32.vlgmr.msra.gmra.mrb[6].mxu0 %vm297_vm1, %v593_v29 }
 0x3e7   :  { %2583 = vmatpush3.msra.mxu0 %v2300_v0 }
 0x3e8   :  { %2587 = vmatprep.subr.mxu0 %v497_v8 }
 0x3e9   :  { %v2567_v58 = vpop.f32.mrb[8].mxu1 }
 0x3ea   :  { %v753_v60 = vpop.f32.mrb[9].mxu1  ;;  %v759_v61 = vadd.f32 %v2567_v58, %v2291_v59 }
 0x3eb   :  { %v754_v62 = vadd.f32 %v2291_v59, %v753_v60 }
 0x3ed   :  { %v2760_v63 = vpack.c.bf16 %v759_v61, %v754_v62 }
 0x3ef   :  { %2761 = vmatprep.subr.bf16.mxu1 %v2760_v63 }
 0x3f0   :  { %2763 = vmatpush3.bf16.msra.mxu1 %v2760_v63 }
 0x3f1   :  { %2765 = vmatprep.subr.bf16.mxu1 %v2764_v11 }
 0x4b9   :  { %v2574_v37 = vpop.f32.mrb[6].mxu0 }
 0x4ba   :  { %v850_v38 = vmul.f32 0.35355338, %v2574_v37  ;;  %v840_v40 = vpop.f32.mrb[7].mxu0  ;;  %v2313_v37 = vld [vmem:[%s3289_s1 + $0x140] sm:$0xff] }
 0x4bb   :  { %v849_v41 = vmul.f32 0.35355338, %v840_v40  ;;  %v2315_v40 = vld [vmem:[%s3289_s1 + $0x150] sm:$0xff] }
 0x4bc   :  { %vm852_vm6 = vcmp.eq.f32.partialorder %v850_v38, 0.0 }
 0x4bd   :  { %v854_v42 = vsel %vm852_vm6, -inf, %v850_v38  ;;  %vm851_vm7 = vcmp.eq.f32.partialorder %v849_v41, 0.0  ;;  %v2314_v38 = vld [vmem:[%s3289_s1 + $0x148] sm:$0xff] }
 0x4be   :  { %v853_v43 = vsel %vm851_vm7, -inf, %v849_v41  ;;  %v856_v44 = vadd.f32 %v854_v42, %v3021_v39  ;;  %v2780_v41 = vpack.c.bf16 %v2314_v38, %v2313_v37  ;;  %v2316_v42 = vld [vmem:[%s3289_s1 + $0x158] sm:$0xff] }
 0x4bf   :  { %v855_v45 = vadd.f32 %v853_v43, %v3016_v36  ;;  %v2784_v43 = vpack.c.bf16 %v2316_v42, %v2315_v40  ;;  %v2346_v42 = vld [vmem:[%s3289_s1 + $0x160] sm:$0xff] }
 0x4c0   :  { %v860_v46 = vsel %vm393_vm5, %v856_v44, -inf }
 0x4c1   :  { %861 = vmax.xlane.f32.xlu1 %v860_v46  ;;  %v857_v47 = vsel %vm393_vm5, %v855_v45, -inf }
 0x4c2   :  { %858 = vmax.xlane.f32.xlu0 %v857_v47 }
 0x54e   :  { %v862_v48 = vpop.xlane.xlu1 %861 }
 0x54f   :  { %v864_v49 = vsub.f32 %v856_v44, %v862_v48  ;;  %v859_v50 = vpop.xlane.xlu0 %858 }
 0x550   :  { %v863_v51 = vsub.f32 %v855_v45, %v859_v50 }
 0x551   :  { %v867_v52 = vmul.f32 1.442695, %v864_v49 }
 0x552   :  { %v865_v53 = vmul.f32 1.442695, %v863_v51 }
 0x553   :  { %2849 = vpow2.f32 %v867_v52 }
 0x554   :  { %2851 = vpow2.f32 %v865_v53 }
 0x55d   :  { %v2850_v54 = vpop.eup %2849 }
 0x55e   :  { %v2852_v55 = vpop.eup %2851  ;;  %v872_v56 = vsel %vm393_vm5, %v2850_v54, 0.0 }
 0x55f   :  { %873 = vadd.xlane.f32.xlu1 %v872_v56  ;;  %v869_v57 = vsel %vm393_vm5, %v2852_v55, 0.0 }
 0x560   :  { %870 = vadd.xlane.f32.xlu0 %v869_v57 }
 0x5ec   :  { %v874_v1 = vpop.xlane.xlu1 %873 }
 0x5ed   :  { %2853 = vrcp.f32 %v874_v1  ;;  %v871_v2 = vpop.xlane.xlu0 %870  ;;  %v2326_v1 = vld [vmem:[%s3290_s2 + $0xa] ss:$0 sm:$0xff] }
 0x5ee   :  { %2855 = vrcp.f32 %v871_v2 }
 0x5f7   :  { %v2854_v3 = vpop.eup %2853 }
 0x5f8   :  { %v2856_v4 = vpop.eup %2855  ;;  %v878_v7 = vmul.f32 %v2854_v3, %v2850_v54 }
 0x5f9   :  { %v877_v6 = vmul.f32 %v2856_v4, %v2852_v55 }
 0x5fb   :  { %2579 = vmatprep.mubr.msk.f32.mxu1 %vm393_vm5, %v877_v6 }
 0x5fc   :  { %2580 = vmatmul.mubr.msk.f32.vlgmr.msra.gmra.mrb[10].mxu1 %vm393_vm5, %v878_v7  ;;  %v2335_v7 = vld [vmem:[%s3292_s4 + $0x10] sm:$0xff] }
 0x5fd   :  { %2600 = vmatprep.mubr.msk.f32.mxu1 %vm49_vm0, %v2950_v5  ;;  %2767 = vmatpush3.bf16.msra.mxu1 %v2764_v11 }
 0x5fe   :  { %2769 = vmatprep.subr.bf16.mxu1 %v2768_v15 }
 0x601   :  { %2771 = vmatpush3.bf16.msra.mxu1 %v2768_v15  ;;  %v2342_v15 = vld [vmem:[%s3289_s1 + $0xe0] sm:$0xff] }
 0x602   :  { %2781 = vmatprep.subr.bf16.mxu1 %v2780_v41  ;;  %v2806_v17 = vpack.c.bf16 %v2343_v16, %v2342_v15 }
 0x604   :  { %2601 = vmatmul.mubr.msk.f32.vlgmr.msra.gmra.mrb[12].mxu1 %vm49_vm0, %v2971_v13 }
 0x605   :  { %2622 = vmatprep.mubr.msk.f32.mxu1 %vm49_vm0, %v2950_v5  ;;  %2783 = vmatpush3.bf16.msra.mxu1 %v2780_v41 }
 0x606   :  { %2785 = vmatprep.subr.bf16.mxu1 %v2784_v43 }
 0x609   :  { %2787 = vmatpush3.bf16.msra.mxu1 %v2784_v43  ;;  %v2347_v43 = vld [vmem:[%s3289_s1 + $0x168] sm:$0xff] }
 0x60c   :  { %2623 = vmatmul.mubr.msk.f32.vlgmr.msra.gmra.mrb[14].mxu1 %vm49_vm0, %v2971_v13 }
 0x6cf   :  { %v2581_v18 = vpop.f32.mrb[10].mxu1 }
 0x6d0   :  { %v951_v19 = vpop.f32.mrb[11].mxu1 }
 0x6d1   :  { %2584 = vmatprep.mubr.msk.f32.mxu0 %vm297_vm1, %v951_v19  ;;  %v2339_v19 = vld [vmem:[%s3289_s1 + $0x68] sm:$0xff] }
 0x6d2   :  { %2585 = vmatmul.mubr.msk.f32.vlgmr.msra.gmra.mrb[8].mxu0 %vm297_vm1, %v2581_v18  ;;  %v2338_v18 = vld [vmem:[%s3289_s1 + $0x60] sm:$0xff] }
 0x6d3   :  { %2588 = vmatpush3.msra.mxu0 %v497_v8  ;;  %2589 = vmatprep.mubr.msk.f32.mxu0 %vm297_vm1, %v3075_v24  ;;  %v2318_v24 = vld [vmem:[%s3290_s2 + $0x2] ss:$0 sm:$0xff] }
 0x6d4   :  { %2773 = vmatprep.subr.bf16.mxu0 %v2772_v20 }
 0x6d7   :  { %v2602_v27 = vpop.f32.mrb[12].mxu1 }
 0x6d8   :  { %v1219_v28 = vadd.f32 %v2602_v27, %v2318_v24  ;;  %v1213_v29 = vpop.f32.mrb[13].mxu1  ;;  %v2345_v27 = vld [vmem:[%s3289_s1 + $0xf8] sm:$0xff] }
 0x6d9   :  { %v1214_v30 = vadd.f32 %v2318_v24, %v1213_v29  ;;  %v2344_v24 = vld [vmem:[%s3289_s1 + $0xf0] sm:$0xff] }
 0x6da   :  { %2590 = vmatmul.mubr.msk.f32.vlgmr.msra.gmra.mrb[8].mxu0 %vm297_vm1, %v3073_v23  ;;  %v2322_v23 = vld [vmem:[%s3290_s2 + $0x6] ss:$0 sm:$0xff] }
 0x6db   :  { %2775 = vmatpush3.bf16.msra.mxu0 %v2772_v20  ;;  %2611 = vmatprep.mubr.msk.f32.mxu0 %vm49_vm0, %v2950_v5  ;;  %v2798_v20 = vpack.c.bf16 %v2339_v19, %v2338_v18 }
 0x6dc   :  { %2777 = vmatprep.subr.bf16.mxu0 %v2776_v26 }
 0x6df   :  { %2779 = vmatpush3.bf16.msra.mxu0 %v2776_v26  ;;  %v2624_v0 = vpop.f32.mrb[14].mxu1  ;;  %v2802_v26 = vpack.c.bf16 %v2341_v25, %v2340_v22 }
 0x6e0   :  { %v1379_v2 = vpop.f32.mrb[15].mxu1  ;;  %v1385_v3 = vadd.f32 %v2624_v0, %v2326_v1 }
 0x6e1   :  { %v1380_v4 = vadd.f32 %v2326_v1, %v1379_v2  ;;  %v2359_v1 = vld [vmem:[%s3290_s2 + $0xb] ss:$0 sm:$0xff] }
 0x6e2   :  { %2612 = vmatmul.mubr.msk.f32.vlgmr.msra.gmra.mrb[10].mxu0 %vm49_vm0, %v2971_v13 }
 0x6e3   :  { %2629 = vmatprep.mubr.msk.f32.mxu0 %vm297_vm1, %v1214_v30  ;;  %v2794_v6 = vpack.c.bf16 %v1385_v3, %v1380_v4  ;;  %v2810_v30 = vpack.c.bf16 %v2345_v27, %v2344_v24 }
 0x6e5   :  { %2795 = vmatprep.subr.bf16.mxu1 %v2794_v6 }
 0x6e6   :  { %2797 = vmatpush3.bf16.msra.mxu1 %v2794_v6 }
 0x6e7   :  { %2799 = vmatprep.subr.bf16.mxu1 %v2798_v20 }
 0x7b5   :  { %v2613_v31 = vpop.f32.mrb[10].mxu0 }
 0x7b6   :  { %v1302_v32 = vadd.f32 %v2613_v31, %v2322_v23  ;;  %v1296_v33 = vpop.f32.mrb[11].mxu0 }
 0x7b7   :  { %v1297_v34 = vadd.f32 %v2322_v23, %v1296_v33  ;;  %v2351_v23 = vld [vmem:[%s3290_s2 + $0x3] ss:$0 sm:$0xff] }
 0x7b9   :  { %v2788_v35 = vpack.c.bf16 %v1302_v32, %v1297_v34 }
 0x7bb   :  { %2790 = vmatprep.subr.msk.bf16.mxu0 %vm2987_vm2, %v2788_v35 }
 0x7bc   :  { %2793 = vmatpush3.bf16.xpose.msk.msra.mxu0 %vm2987_vm2, %v2788_v35  ;;  %v2355_v35 = vld [vmem:[%s3290_s2 + $0x7] ss:$0 sm:$0xff] }
 0x7bd   :  { %2639 = vmatprep.subr.mxu0 %v2335_v7 }
 0x7c3   :  { %2630 = vmatmul.mubr.msk.f32.vlgmr.msra.gmra.mrb[12].mxu0 %vm297_vm1, %v1219_v28 }
 0x7c4   :  { %2640 = vmatpush3.msra.mxu0 %v2335_v7  ;;  %v2368_v7 = vld [vmem:[%s3292_s4 + $0x18] sm:$0xff] }
 0x7c5   :  { %2807 = vmatprep.subr.bf16.mxu0 %v2806_v17 }
 0x896   :  { %v2631_v44 = vpop.f32.mrb[12].mxu0 }
 0x897   :  { %v1476_v45 = vmul.f32 0.35355338, %v2631_v44  ;;  %v1466_v46 = vpop.f32.mrb[13].mxu0  ;;  %v2348_v44 = vld [vmem:[%s3289_s1 + $0x170] sm:$0xff] }
 0x898   :  { %v1475_v47 = vmul.f32 0.35355338, %v1466_v46  ;;  %v2818_v46 = vpack.c.bf16 %v2349_v21, %v2348_v44 }
 0x899   :  { %vm1478_vm8 = vcmp.eq.f32.partialorder %v1476_v45, 0.0 }
 0x89a   :  { %v1480_v48 = vsel %vm1478_vm8, -inf, %v1476_v45  ;;  %vm1477_vm9 = vcmp.eq.f32.partialorder %v1475_v47, 0.0  ;;  %v2814_v45 = vpack.c.bf16 %v2347_v43, %v2346_v42 }
 0x89b   :  { %v1479_v49 = vsel %vm1477_vm9, -inf, %v1475_v47  ;;  %v1482_v50 = vadd.f32 %v1480_v48, %v3021_v39 }
 0x89c   :  { %v1481_v51 = vadd.f32 %v1479_v49, %v3016_v36 }
 0x89d   :  { %v1486_v52 = vsel %vm393_vm5, %v1482_v50, -inf }
 0x89e   :  { %1487 = vmax.xlane.f32.xlu1 %v1486_v52  ;;  %v1483_v53 = vsel %vm393_vm5, %v1481_v51, -inf }
 0x89f   :  { %1484 = vmax.xlane.f32.xlu0 %v1483_v53 }
 0x92b   :  { %v1488_v54 = vpop.xlane.xlu1 %1487 }
 0x92c   :  { %v1490_v55 = vsub.f32 %v1482_v50, %v1488_v54  ;;  %v1485_v56 = vpop.xlane.xlu0 %1484 }
 0x92d   :  { %v1489_v57 = vsub.f32 %v1481_v51, %v1485_v56 }
 0x92e   :  { %v1493_v58 = vmul.f32 1.442695, %v1490_v55 }
 0x92f   :  { %v1491_v59 = vmul.f32 1.442695, %v1489_v57 }
 0x930   :  { %2857 = vpow2.f32 %v1493_v58 }
 0x931   :  { %2859 = vpow2.f32 %v1491_v59 }
 0x93a   :  { %v2858_v60 = vpop.eup %2857 }
 0x93b   :  { %v2860_v61 = vpop.eup %2859  ;;  %v1498_v62 = vsel %vm393_vm5, %v2858_v60, 0.0 }
 0x93c   :  { %1499 = vadd.xlane.f32.xlu1 %v1498_v62  ;;  %v1495_v63 = vsel %vm393_vm5, %v2860_v61, 0.0 }
 0x93d   :  { %1496 = vadd.xlane.f32.xlu0 %v1495_v63 }
 0x9c9   :  { %v1500_v8 = vpop.xlane.xlu1 %1499 }
 0x9ca   :  { %2861 = vrcp.f32 %v1500_v8  ;;  %v1497_v9 = vpop.xlane.xlu0 %1496 }
 0x9cb   :  { %2863 = vrcp.f32 %v1497_v9 }
 0x9d4   :  { %v2862_v10 = vpop.eup %2861 }
 0x9d5   :  { %v2864_v11 = vpop.eup %2863  ;;  %v1504_v14 = vmul.f32 %v2862_v10, %v2858_v60 }
 0x9d6   :  { %v1503_v12 = vmul.f32 %v2864_v11, %v2860_v61 }
 0x9d8   :  { %2636 = vmatprep.mubr.msk.f32.mxu1 %vm393_vm5, %v1503_v12 }
 0x9d9   :  { %2637 = vmatmul.mubr.msk.f32.vlgmr.msra.gmra.mrb[16].mxu1 %vm393_vm5, %v1504_v14 }
 0x9da   :  { %2652 = vmatprep.mubr.msk.f32.mxu1 %vm49_vm0, %v2950_v5  ;;  %2801 = vmatpush3.bf16.msra.mxu1 %v2798_v20 }
 0x9db   :  { %2803 = vmatprep.subr.bf16.mxu1 %v2802_v26 }
 0x9de   :  { %2805 = vmatpush3.bf16.msra.mxu1 %v2802_v26 }
 0x9df   :  { %2815 = vmatprep.subr.bf16.mxu1 %v2814_v45 }
 0x9e1   :  { %2653 = vmatmul.mubr.msk.f32.vlgmr.msra.gmra.mrb[18].mxu1 %vm49_vm0, %v2971_v13 }
 0x9e2   :  { %2674 = vmatprep.mubr.msk.f32.mxu1 %vm49_vm0, %v2950_v5  ;;  %2817 = vmatpush3.bf16.msra.mxu1 %v2814_v45 }
 0x9e3   :  { %2819 = vmatprep.subr.bf16.mxu1 %v2818_v46 }
 0x9e6   :  { %2821 = vmatpush3.bf16.msra.mxu1 %v2818_v46 }
 0x9e9   :  { %2675 = vmatmul.mubr.msk.f32.vlgmr.msra.gmra.mrb[20].mxu1 %vm49_vm0, %v2971_v13 }
 0xaac   :  { %v2638_v28 = vpop.f32.mrb[16].mxu1 }
 0xaad   :  { %v1577_v29 = vpop.f32.mrb[17].mxu1 }
 0xaae   :  { %2641 = vmatprep.mubr.msk.f32.mxu0 %vm297_vm1, %v1577_v29 }
 0xaaf   :  { %2642 = vmatmul.mubr.msk.f32.vlgmr.msra.gmra.mrb[8].mxu0 %vm297_vm1, %v2638_v28 }
 0xab0   :  { %2809 = vmatpush3.bf16.msra.mxu0 %v2806_v17  ;;  %2663 = vmatprep.mubr.msk.f32.mxu0 %vm49_vm0, %v2950_v5  ;;  %v2371_v17 = vld [vmem:[%s3293_s5] ss:$0 sm:$0xff] }
 0xab1   :  { %2811 = vmatprep.subr.bf16.mxu0 %v2810_v30 }
 0xab4   :  { %2813 = vmatpush3.bf16.msra.mxu0 %v2810_v30  ;;  %v2654_v31 = vpop.f32.mrb[18].mxu1 }
 0xab5   :  { %v1766_v32 = vadd.f32 %v2654_v31, %v2351_v23  ;;  %v1760_v33 = vpop.f32.mrb[19].mxu1 }
 0xab6   :  { %v1761_v34 = vadd.f32 %v2351_v23, %v1760_v33 }
 0xab7   :  { %2664 = vmatmul.mubr.msk.f32.vlgmr.msra.gmra.mrb[14].mxu0 %vm49_vm0, %v2971_v13 }
 0xab8   :  { %2681 = vmatprep.mubr.msk.f32.mxu0 %vm297_vm1, %v1761_v34 }
 0xabc   :  { %v2676_v0 = vpop.f32.mrb[20].mxu1 }
 0xabd   :  { %v1926_v2 = vpop.f32.mrb[21].mxu1  ;;  %v1932_v3 = vadd.f32 %v2676_v0, %v2359_v1 }
 0xabe   :  { %v1927_v4 = vadd.f32 %v2359_v1, %v1926_v2 }
 0xac0   :  { %v2828_v6 = vpack.c.bf16 %v1932_v3, %v1927_v4 }
 0xac2   :  { %2829 = vmatprep.subr.bf16.mxu1 %v2828_v6 }
 0xac3   :  { %2831 = vmatpush3.bf16.msra.mxu1 %v2828_v6 }
 0xb8a   :  { %v2665_v5 = vpop.f32.mrb[14].mxu0 }
 0xb8b   :  { %v1849_v37 = vadd.f32 %v2665_v5, %v2355_v35  ;;  %v1843_v38 = vpop.f32.mrb[15].mxu0 }
 0xb8c   :  { %v1844_v40 = vadd.f32 %v2355_v35, %v1843_v38 }
 0xb8e   :  { %v2822_v41 = vpack.c.bf16 %v1849_v37, %v1844_v40 }
 0xb90   :  { %2824 = vmatprep.subr.msk.bf16.mxu0 %vm2987_vm2, %v2822_v41 }
 0xb91   :  { %2827 = vmatpush3.bf16.xpose.msk.msra.mxu0 %vm2987_vm2, %v2822_v41 }
 0xb92   :  { %2691 = vmatprep.subr.mxu0 %v2368_v7 }
 0xb98   :  { %2682 = vmatmul.mubr.msk.f32.vlgmr.msra.gmra.mrb[16].mxu0 %vm297_vm1, %v1766_v32 }
 0xb99   :  { %2692 = vmatpush3.msra.mxu0 %v2368_v7 }
 0xc6b   :  { %v2683_v47 = vpop.f32.mrb[16].mxu0 }
 0xc6c   :  { %v2023_v48 = vmul.f32 0.35355338, %v2683_v47  ;;  %v2013_v49 = vpop.f32.mrb[17].mxu0 }
 0xc6d   :  { %v2022_v50 = vmul.f32 0.35355338, %v2013_v49 }
 0xc6e   :  { %vm2025_vm10 = vcmp.eq.f32.partialorder %v2023_v48, 0.0 }
 0xc6f   :  { %v2027_v51 = vsel %vm2025_vm10, -inf, %v2023_v48  ;;  %vm2024_vm11 = vcmp.eq.f32.partialorder %v2022_v50, 0.0 }
 0xc70   :  { %v2026_v52 = vsel %vm2024_vm11, -inf, %v2022_v50  ;;  %v2029_v53 = vadd.f32 %v2027_v51, %v3021_v39 }
 0xc71   :  { %v2028_v54 = vadd.f32 %v2026_v52, %v3016_v36 }
 0xc72   :  { %v2033_v55 = vsel %vm393_vm5, %v2029_v53, -inf }
 0xc73   :  { %2034 = vmax.xlane.f32.xlu1 %v2033_v55  ;;  %v2030_v56 = vsel %vm393_vm5, %v2028_v54, -inf }
 0xc74   :  { %2031 = vmax.xlane.f32.xlu0 %v2030_v56 }
 0xd00   :  { %v2035_v57 = vpop.xlane.xlu1 %2034 }
 0xd01   :  { %v2037_v13 = vsub.f32 %v2029_v53, %v2035_v57  ;;  %v2032_v58 = vpop.xlane.xlu0 %2031 }
 0xd02   :  { %v2036_v59 = vsub.f32 %v2028_v54, %v2032_v58 }
 0xd03   :  { %v2040_v60 = vmul.f32 1.442695, %v2037_v13 }
 0xd04   :  { %v2038_v61 = vmul.f32 1.442695, %v2036_v59 }
 0xd05   :  { %2865 = vpow2.f32 %v2040_v60 }
 0xd06   :  { %2867 = vpow2.f32 %v2038_v61 }
 0xd0f   :  { %v2866_v62 = vpop.eup %2865 }
 0xd10   :  { %v2868_v63 = vpop.eup %2867  ;;  %v2045_v39 = vsel %vm393_vm5, %v2866_v62, 0.0 }
 0xd11   :  { %2046 = vadd.xlane.f32.xlu1 %v2045_v39  ;;  %v2042_v36 = vsel %vm393_vm5, %v2868_v63, 0.0 }
 0xd12   :  { %2043 = vadd.xlane.f32.xlu0 %v2042_v36 }
 0xd9e   :  { %v2047_v8 = vpop.xlane.xlu1 %2046 }
 0xd9f   :  { %2869 = vrcp.f32 %v2047_v8  ;;  %v2044_v9 = vpop.xlane.xlu0 %2043 }
 0xda0   :  { %2871 = vrcp.f32 %v2044_v9 }
 0xda9   :  { %v2870_v10 = vpop.eup %2869 }
 0xdaa   :  { %v2872_v11 = vpop.eup %2871  ;;  %v2051_v14 = vmul.f32 %v2870_v10, %v2866_v62 }
 0xdab   :  { %v2050_v12 = vmul.f32 %v2872_v11, %v2868_v63 }
 0xdad   :  { %2688 = vmatprep.mubr.msk.f32.mxu1 %vm393_vm5, %v2050_v12 }
 0xdae   :  { %2689 = vmatmul.mubr.msk.f32.vlgmr.msra.gmra.mrb[22].mxu1 %vm393_vm5, %v2051_v14 }
 0xe81   :  { %v2690_v15 = vpop.f32.mrb[22].mxu1 }
 0xe82   :  { %v2124_v16 = vpop.f32.mrb[23].mxu1 }
 0xe83   :  { %2693 = vmatprep.mubr.msk.f32.mxu0 %vm297_vm1, %v2124_v16 }
 0xe84   :  { %2694 = vmatmul.mubr.msk.f32.vlgmr.msra.gmra.mrb[8].mxu0 %vm297_vm1, %v2690_v15 }
 0xf57   :  { %v2695_v18 = vpop.f32.mrb[8].mxu0 }
 0xf58   :  { %v2226_v19 = vadd.f32 %v2695_v18, %v2371_v17  ;;  %v2207_v20 = vpop.f32.mrb[9].mxu0 }
 0xf59   :  { %v2225_v22 = vadd.f32 %v2371_v17, %v2207_v20 }
 0xf5a   :  { %2228 = vst.msk [vmem:[#allocation2 + $0x8] sm:$0xff] %vm49_vm0, %v2226_v19 }
 0xf5b   :  { %2227 = vst.msk [vmem:[#allocation2] sm:$0xff] %vm49_vm0, %v2225_v22 }
 0xf5c   :  { %2884 = shalt.err (!%p2881_p4)
}
 0xf5d   :  { %s2885_s7 = scalar_lea.hbm %s3294_s6, 256 }
 0xf5e   :  { %p2886_p5 = scmp.ne.s32.totalorder %s3294_s6, %s2885_s7  ;;  %p2889_p6 = scmp.lt.u32.totalorder %s2885_s7, %s3294_s6 }
 0xf60   :  { %p2891_p7 = pnand %p2889_p6, %p2886_p5 }
 0xf62   :  { %2894 = shalt.err (!%p2891_p7)
}
 0xf63   :  { %s2898_s11 = smov 128   ;;  %s2899_s12 = smov 8  }
 0xf64   :  { %2240 = dma.vmem_to_hbm [thread:$0]  %s2235_s28, 256, %s3294_s6, [#allocation3], %s2898_s11, %s2898_s11, %s2899_s12  }
 0xf65   :  { %2895 = dma.done.wait [#allocation3], 256  }
 0xf66   :  { %2896 = vsyncadd [#allocation3], 4294967040 }
 0xf67   :  { %2244 = vsyncpa [#allocation3], 1 }

</bundles_post_ra>
